<compile_context>
chip_gen: v7x
topology: tpu7x:2x2x1
jax: 0.10.0
libtpu: 0.0.40
codegen_flags: <defaults>
</compile_context>

<pallas_src>
import functools

import numpy as np
import jax
import jax.numpy as jnp
from jax.experimental import pallas as pl
from jax.experimental.pallas import tpu as pltpu


def _div_by_const(x, c):
    """Integer divide of a non-negative int32 array by a compile-time constant."""
    if c & (c - 1) == 0:                          # power of two -> shift (always lowers)
        return jnp.right_shift(x, int(c).bit_length() - 1)
    return x // c


def _social_circle_kernel(packed_ref, w3_ref, bias_ref, fsc_ref, sc_ref, *,
                          partitions, nei, batch_block, mxu_dtype):
    P, N, TB = partitions, nei, batch_block
    L = TB * N                      # lane axis: TB batches x N neighbors, flattened

    last_x = packed_ref[0:1, :]     # (1, L)
    last_y = packed_ref[1:2, :]
    first_x = packed_ref[2:3, :]
    first_y = packed_ref[3:4, :]
    traj_sum = packed_ref[4:5, :]   # sum over (T, xy) -> validity-mask source
    f_dir = packed_ref[5:6, :]      # atan2(x, y) mod 2*pi, precomputed in glue

    dx = last_x - first_x
    dy = last_y - first_y
    f_vel = jnp.sqrt(dx * dx + dy * dy)                       # (1, L) velocity factor
    f_dist = jnp.sqrt(last_x * last_x + last_y * last_y)      # (1, L) distance factor

    valid = traj_sum != 0.0
    # Reference semantics: truncating int cast (f_dir >= 0); a value landing exactly on
    # the 2*pi edge maps to bin P and is dropped from every partition (matches torch).
    ang = (f_dir / (2.0 * np.pi / P)).astype(jnp.int32)
    ang = jnp.where(valid, ang, -1)                           # (1, L) int32 bin index

    # Thin iotas only: batch membership X (TB, L) and partition one-hot (P, L).
    row_t = jax.lax.broadcasted_iota(jnp.int32, (TB, 1), 0)   # (TB, 1)
    col_l = jax.lax.broadcasted_iota(jnp.int32, (1, L), 1)    # (1, L)
    col_batch = _div_by_const(col_l, N)                       # (1, L)
    x_mask = (row_t == col_batch).astype(mxu_dtype)           # (TB, L)

    p_row = jax.lax.broadcasted_iota(jnp.int32, (P, 1), 0)    # (P, 1)
    onehot_t = (p_row == ang).astype(mxu_dtype)               # (P, L); ang=-1 matches none

    # Feature rows: [velocity, distance, direction, 1, 1, 1].  The three ones-rows make
    # the einsum emit the per-partition counts already replicated 3x along the lanes.
    ones = jnp.ones_like(f_vel)
    feat = jnp.concatenate([f_vel, f_dist, f_dir, ones, ones, ones],
                           axis=0).astype(mxu_dtype)          # (6, L)
    z = (feat[:, None, :] * onehot_t[None, :, :]).reshape(6 * P, L)   # (6P, L)

    # One MXU pass: sums[t, f*P + p] over all neighbors of batch t in partition p.
    sums = jnp.einsum('tl,cl->tc', x_mask, z,
                      preferred_element_type=jnp.float32)     # (TB, 6P)

    feat_sums = sums[:, :3 * P]                               # (TB, 3P)
    counts3 = sums[:, 3 * P:]                                 # (TB, 3P) counts, tiled 3x
    # TODO(synk): approx=True would move the reciprocal to the otherwise-idle EUP, but
    # its ~1e-3-level relative error is borderline against the rtol/atol=1e-3 check.
    sc_slab = feat_sums * pl.reciprocal(counts3 + 1e-4, approx=False)  # (TB, 3P)

    # TrajEncoding: block-diagonal Linear(3 -> D) per partition + ReLU, producing the
    # f_sc slab directly in lane-dense (TB, P*D) layout.
    fsc = jnp.dot(sc_slab, w3_ref[...], preferred_element_type=jnp.float32) + bias_ref[...]
    fsc = jnp.maximum(fsc, 0.0)                               # (TB, P*D)

    fsc_ref[...] = fsc.astype(fsc_ref.dtype)
    sc_ref[...] = sc_slab.astype(sc_ref.dtype)


def _tensorcores_per_chip():
    """Best-effort TensorCore count per chip (v7x has 2, v5e/v6e have 1)."""
    try:
        kind = jax.devices()[0].device_kind.lower()
    except Exception:
        return 1
    return 2 if "v7" in kind else 1


def _scratch_bytes_estimate(tb, nei, partitions, d_out):
    """Conservative per-step VMEM estimate (inputs/outputs double-buffered + temps)."""
    L = tb * nei
    P = partitions
    total = 0
    total += 2 * 6 * L * 4                       # packed input block (x2 buffers)
    total += 2 * 3 * P * P * d_out * 4           # block-diagonal weight
    total += 2 * P * d_out * 4                   # bias row
    total += 2 * tb * (P * d_out + 3 * P) * 4    # output blocks
    total += 3 * tb * L * 4                      # batch mask + int/bool precursors
    total += (6 + 13 * P) * L * 4                # feat rows, one-hot, Z and its precursor
    total += 3 * tb * (6 * P + 3 * P + P * d_out) * 4   # sums / sc / fsc temporaries
    return total


def _pick_batch_block(batch, nei, partitions, d_out):
    """Pick TB: largest legal block under a VMEM budget; >=2 even steps on 2-TC chips."""
    budget = 10 * 1024 * 1024       # safe under the default scoped-VMEM limit everywhere

    def ok_shape(tb):
        if tb == batch:             # full-extent blocks are always legal
            return True
        return tb % 8 == 0 and (tb * nei) % 128 == 0

    cands = [tb for tb in range(1, batch + 1)
             if batch % tb == 0 and ok_shape(tb)
             and _scratch_bytes_estimate(tb, nei, partitions, d_out) <= budget]
    if not cands:
        cands = [min(tb for tb in range(1, batch + 1)
                     if batch % tb == 0 and ok_shape(tb))]
    if _tensorcores_per_chip() >= 2:
        multi = [tb for tb in cands if (batch // tb) % 2 == 0]
        if multi:
            return max(multi)       # even >=2-step grid so both TCs get work
    return max(cands)               # single TC: one big step, no per-step overhead


@functools.partial(jax.jit, static_argnames=("partitions", "batch_block", "mxu_dtype"))
def social_circle_layer(trajs, nei_trajs, w, b, *, partitions, batch_block=None,
                        mxu_dtype=jnp.float32):
    """trajs: (B, T, 2), nei_trajs: (B, N, T, 2), w: (3, d), b: (d,).

    `mxu_dtype=jnp.bfloat16` may be passed on v5e to avoid the emulated f32 MXU path
    (re-validate tolerances before enabling).
    """
    # TODO(synk): `trajs` is only needed for relative_velocity / use_move_direction
    # (both disabled by default), so the ego trajectory is unused here.
    del trajs
    B, N, T, _ = nei_trajs.shape
    P = partitions
    d_out = w.shape[1]

    if batch_block is None:
        batch_block = _pick_batch_block(B, N, P, d_out)
    TB = batch_block
    assert B % TB == 0, "batch must be divisible by batch_block"

    # Thin glue (fused under jit): only the slices/reductions the kernel consumes are
    # materialized -- one full read of nei_trajs for the mask sum, O(B*N) otherwise.
    # TODO(synk): atan2/mod stay in O(B*N) JAX glue (packed into the same input slab, so
    # no extra DMA stream) because in-kernel Mosaic atan2 lowering is not relied upon.
    nei_f32 = nei_trajs.astype(jnp.float32)
    last = nei_f32[:, :, -1, :]                    # (B, N, 2)
    first = nei_f32[:, :, 0, :]                    # (B, N, 2)
    traj_sum = jnp.sum(nei_f32, axis=(-1, -2))     # (B, N)
    f_dir = jnp.mod(jnp.arctan2(last[..., 0], last[..., 1]), 2.0 * np.pi)

    packed = jnp.stack([last[..., 0], last[..., 1],
                        first[..., 0], first[..., 1],
                        traj_sum, f_dir], axis=0).reshape(6, B * N).astype(jnp.float32)

    # Block-diagonal TrajEncoding weight: w3[f*P + p, p*D + d] = w[f, d]; bias tiled P x.
    w32 = w.astype(jnp.float32)
    b32 = b.astype(jnp.float32)
    eye_p = jnp.eye(P, dtype=jnp.float32)
    w3 = jnp.einsum('fd,pq->fpqd', w32, eye_p).reshape(3 * P, P * d_out)
    bias_row = jnp.tile(b32, (P,)).reshape(1, P * d_out)

    kernel = functools.partial(_social_circle_kernel, partitions=P, nei=N,
                               batch_block=TB, mxu_dtype=mxu_dtype)
    fsc_slab, sc_slab = pl.pallas_call(
        kernel,
        out_shape=(jax.ShapeDtypeStruct((B, P * d_out), jnp.float32),
                   jax.ShapeDtypeStruct((B, 3 * P), jnp.float32)),
        grid=(B // TB,),
        in_specs=[
            pl.BlockSpec((6, TB * N), lambda i: (0, i)),
            pl.BlockSpec((3 * P, P * d_out), lambda i: (0, 0)),
            pl.BlockSpec((1, P * d_out), lambda i: (0, 0)),
        ],
        out_specs=(
            pl.BlockSpec((TB, P * d_out), lambda i: (i, 0)),
            pl.BlockSpec((TB, 3 * P), lambda i: (i, 0)),
        ),
        compiler_params=pltpu.CompilerParams(dimension_semantics=("parallel",)),
    )(packed, w3, bias_row)

    # Layout plumbing back to the module's (B, P, D) / (B, P, 3) outputs (plain XLA).
    fsc = fsc_slab.reshape(B, P, d_out)
    sc = jnp.transpose(sc_slab.reshape(B, 3, P), (0, 2, 1))
    return fsc, sc


def reference(trajs, nei_trajs, w, b, partitions):
    """Pure-JAX mirror of the PyTorch forward (default flags)."""
    del trajs
    nei_vector = nei_trajs[..., -1, :] - nei_trajs[..., 0, :]
    nei_pos = nei_trajs[..., -1, :]
    f_vel = jnp.linalg.norm(nei_vector, axis=-1)
    f_dist = jnp.linalg.norm(nei_pos, axis=-1)
    f_dir = jnp.mod(jnp.arctan2(nei_pos[..., 0], nei_pos[..., 1]), 2.0 * np.pi)
    ang = (f_dir / (2.0 * np.pi / partitions)).astype(jnp.int32)
    mask = (jnp.sum(nei_trajs, axis=(-1, -2)) != 0).astype(jnp.int32)
    ang = ang * mask + (-1) * (1 - mask)
    per_part = []
    for a in range(partitions):
        m = (ang == a).astype(jnp.float32)
        n = jnp.sum(m, axis=-1) + 1e-4
        per_part.append(jnp.stack([jnp.sum(f_vel * m, -1) / n,
                                   jnp.sum(f_dist * m, -1) / n,
                                   jnp.sum(f_dir * m, -1) / n]))
    sc = jnp.transpose(jnp.stack(per_part), (2, 0, 1))   # (B, P, 3)
    fsc = jnp.maximum(sc @ w + b, 0.0)
    return fsc, sc


if __name__ == "__main__":
    key = jax.random.PRNGKey(0)
    k1, k2, k3, k4 = jax.random.split(key, 4)

    # batch, neighbors, obs steps, partitions, output units
    B, N, T, P, D = 16, 16, 8, 8, 32
    trajs = jax.random.normal(k1, (B, T, 2), jnp.float32)
    nei_trajs = 2.0 * jax.random.normal(k2, (B, N, T, 2), jnp.float32)
    # zero-pad some neighbors to exercise the validity mask
    nei_trajs = nei_trajs.at[0, -3:].set(0.0)
    nei_trajs = nei_trajs.at[1, :2].set(0.0)
    nei_trajs = nei_trajs.at[5, 7].set(0.0)

    # deterministic TrajEncoding parameters (Linear 3 -> D)
    w = 0.3 * jax.random.normal(k3, (3, D), jnp.float32)
    b = 0.1 * jax.random.normal(k4, (D,), jnp.float32)

    f_sc, social_circle = social_circle_layer(trajs, nei_trajs, w, b, partitions=P)
    jax.block_until_ready((f_sc, social_circle))

    f_sc_ref, sc_ref_arr = reference(trajs, nei_trajs, w, b, P)
    np.testing.assert_allclose(np.asarray(social_circle), np.asarray(sc_ref_arr),
                               rtol=1e-3, atol=1e-3)
    np.testing.assert_allclose(np.asarray(f_sc), np.asarray(f_sc_ref),
                               rtol=1e-3, atol=1e-3)
    print("KERNEL_OK")
</pallas_src>

<mosaic_0001>
module attributes {stable_mosaic.version = 11 : i64} {
  func.func @_social_circle_kernel(%arg0: i32, %arg1: memref<6x256xf32, #tpu.memory_space<vmem>>, %arg2: memref<24x256xf32, #tpu.memory_space<vmem>>, %arg3: memref<1x256xf32, #tpu.memory_space<vmem>>, %arg4: memref<16x256xf32, #tpu.memory_space<vmem>>, %arg5: memref<16x24xf32, #tpu.memory_space<vmem>>) attributes {dimension_semantics = [#tpu.dimension_semantics<parallel>], iteration_bounds = array<i64: 1>, scalar_prefetch = 0 : i64, scratch_operands = 0 : i64, tpu.core_type = #tpu.core_type<tc>, window_params = [{transform_indices = @transform_0, window_bounds = array<i64: 6, 256>}, {pipeline_mode = #tpu.pipeline_mode<synchronous>, transform_indices = @transform_1, window_bounds = array<i64: 24, 256>}, {pipeline_mode = #tpu.pipeline_mode<synchronous>, transform_indices = @transform_2, window_bounds = array<i64: 1, 256>}, {transform_indices = @transform_3, window_bounds = array<i64: 16, 256>}, {transform_indices = @transform_4, window_bounds = array<i64: 16, 24>}]} {
    %c0 = arith.constant 0 : index
    %c0_0 = arith.constant 0 : index
    %0 = vector.load %arg1[%c0, %c0_0] : memref<6x256xf32, #tpu.memory_space<vmem>>, vector<1x256xf32>
    %c1 = arith.constant 1 : index
    %c0_1 = arith.constant 0 : index
    %1 = vector.load %arg1[%c1, %c0_1] : memref<6x256xf32, #tpu.memory_space<vmem>>, vector<1x256xf32>
    %c2 = arith.constant 2 : index
    %c0_2 = arith.constant 0 : index
    %2 = vector.load %arg1[%c2, %c0_2] : memref<6x256xf32, #tpu.memory_space<vmem>>, vector<1x256xf32>
    %c3 = arith.constant 3 : index
    %c0_3 = arith.constant 0 : index
    %3 = vector.load %arg1[%c3, %c0_3] : memref<6x256xf32, #tpu.memory_space<vmem>>, vector<1x256xf32>
    %c4 = arith.constant 4 : index
    %c0_4 = arith.constant 0 : index
    %4 = vector.load %arg1[%c4, %c0_4] : memref<6x256xf32, #tpu.memory_space<vmem>>, vector<1x256xf32>
    %c5 = arith.constant 5 : index
    %c0_5 = arith.constant 0 : index
    %5 = vector.load %arg1[%c5, %c0_5] : memref<6x256xf32, #tpu.memory_space<vmem>>, vector<1x256xf32>
    %6 = arith.subf %0, %2 : vector<1x256xf32>
    %7 = arith.subf %1, %3 : vector<1x256xf32>
    %8 = arith.mulf %6, %6 : vector<1x256xf32>
    %9 = arith.mulf %7, %7 : vector<1x256xf32>
    %10 = arith.addf %8, %9 : vector<1x256xf32>
    %11 = math.sqrt %10 : vector<1x256xf32>
    %12 = arith.mulf %0, %0 : vector<1x256xf32>
    %13 = arith.mulf %1, %1 : vector<1x256xf32>
    %14 = arith.addf %12, %13 : vector<1x256xf32>
    %15 = math.sqrt %14 : vector<1x256xf32>
    %cst = arith.constant 0.000000e+00 : f32
    %16 = vector.broadcast %cst : f32 to vector<1x256xf32>
    %17 = arith.cmpf one, %4, %16 : vector<1x256xf32>
    %cst_6 = arith.constant 0.785398185 : f32
    %18 = vector.broadcast %cst_6 : f32 to vector<1x256xf32>
    %19 = arith.divf %5, %18 : vector<1x256xf32>
    %20 = arith.fptosi %19 : vector<1x256xf32> to vector<1x256xi32>
    %c-1_i32 = arith.constant -1 : i32
    %21 = vector.broadcast %c-1_i32 : i32 to vector<1x256xi32>
    %22 = arith.select %17, %20, %21 : vector<1x256xi1>, vector<1x256xi32>
    %23 = tpu.iota {dimensions = array<i32: 0>} : vector<16x1xi32>
    %24 = tpu.iota {dimensions = array<i32: 1>} : vector<1x256xi32>
    %c4_i32 = arith.constant 4 : i32
    %25 = vector.broadcast %c4_i32 : i32 to vector<1x256xi32>
    %26 = arith.shrsi %24, %25 : vector<1x256xi32>
    %27 = vector.broadcast %23 : vector<16x1xi32> to vector<16x256xi32>
    %28 = vector.broadcast %26 : vector<1x256xi32> to vector<16x256xi32>
    %29 = arith.cmpi eq, %27, %28 : vector<16x256xi32>
    %30 = arith.extui %29 : vector<16x256xi1> to vector<16x256xi32>
    %31 = arith.sitofp %30 : vector<16x256xi32> to vector<16x256xf32>
    %32 = tpu.iota {dimensions = array<i32: 0>} : vector<8x1xi32>
    %33 = vector.broadcast %32 : vector<8x1xi32> to vector<8x256xi32>
    %34 = vector.broadcast %22 : vector<1x256xi32> to vector<8x256xi32>
    %35 = arith.cmpi eq, %33, %34 : vector<8x256xi32>
    %36 = arith.extui %35 : vector<8x256xi1> to vector<8x256xi32>
    %37 = arith.sitofp %36 : vector<8x256xi32> to vector<8x256xf32>
    %cst_7 = arith.constant 1.000000e+00 : f32
    %38 = vector.broadcast %cst_7 : f32 to vector<1x256xf32>
    %39 = tpu.concatenate %11, %15, %5, %38, %38, %38 in 0 : vector<1x256xf32>, vector<1x256xf32>, vector<1x256xf32>, vector<1x256xf32>, vector<1x256xf32>, vector<1x256xf32> -> vector<6x256xf32>
    %40 = vector.shape_cast %39 : vector<6x256xf32> to vector<6x1x256xf32>
    %41 = vector.shape_cast %37 : vector<8x256xf32> to vector<1x8x256xf32>
    %42 = vector.broadcast %40 : vector<6x1x256xf32> to vector<6x8x256xf32>
    %43 = vector.broadcast %41 : vector<1x8x256xf32> to vector<6x8x256xf32>
    %44 = arith.mulf %42, %43 : vector<6x8x256xf32>
    %45 = vector.shape_cast %44 : vector<6x8x256xf32> to vector<48x256xf32>
    "tpu.trace_start"() <{level = 10 : i32, message = "tl,cl->tc"}> : () -> ()
    %cst_8 = arith.constant dense<0.000000e+00> : vector<16x48xf32>
    %46 = tpu.matmul %31, %45, %cst_8 {dimension_numbers = #tpu.dot_dimension_numbers<[1], [1], [0], [0], [0, 0, 1, 0], [], []>} : vector<16x256xf32>, vector<48x256xf32>, vector<16x48xf32> -> vector<16x48xf32>
    "tpu.trace_stop"() : () -> ()
    %47 = vector.extract_strided_slice %46 {offsets = [0, 0], sizes = [16, 24], strides = [1, 1]} : vector<16x48xf32> to vector<16x24xf32>
    %48 = vector.extract_strided_slice %46 {offsets = [0, 24], sizes = [16, 24], strides = [1, 1]} : vector<16x48xf32> to vector<16x24xf32>
    %cst_9 = arith.constant 9.99999974E-5 : f32
    %49 = vector.broadcast %cst_9 : f32 to vector<16x24xf32>
    %50 = arith.addf %48, %49 : vector<16x24xf32>
    %51 = tpu.reciprocal %50 : vector<16x24xf32> -> vector<16x24xf32>
    %52 = arith.mulf %47, %51 : vector<16x24xf32>
    %c0_10 = arith.constant 0 : index
    %c0_11 = arith.constant 0 : index
    %53 = vector.load %arg2[%c0_10, %c0_11] : memref<24x256xf32, #tpu.memory_space<vmem>>, vector<24x256xf32>
    %cst_12 = arith.constant dense<0.000000e+00> : vector<16x256xf32>
    %54 = tpu.matmul %52, %53, %cst_12 {dimension_numbers = #tpu.dot_dimension_numbers<[1], [0], [0], [1], [0, 0, 1, 1], [], []>} : vector<16x24xf32>, vector<24x256xf32>, vector<16x256xf32> -> vector<16x256xf32>
    %c0_13 = arith.constant 0 : index
    %c0_14 = arith.constant 0 : index
    %55 = vector.load %arg3[%c0_13, %c0_14] : memref<1x256xf32, #tpu.memory_space<vmem>>, vector<1x256xf32>
    %56 = vector.broadcast %55 : vector<1x256xf32> to vector<16x256xf32>
    %57 = arith.addf %54, %56 : vector<16x256xf32>
    %cst_15 = arith.constant 0.000000e+00 : f32
    %58 = vector.broadcast %cst_15 : f32 to vector<16x256xf32>
    %59 = arith.maximumf %57, %58 : vector<16x256xf32>
    %c0_16 = arith.constant 0 : index
    %c0_17 = arith.constant 0 : index
    %60 = vector.load %arg4[%c0_16, %c0_17] : memref<16x256xf32, #tpu.memory_space<vmem>>, vector<16x256xf32>
    tpu.vector_store %arg4[%c0_16, %c0_17], %59 {strides = array<i32>} : memref<16x256xf32, #tpu.memory_space<vmem>>, vector<16x256xf32>,
    %c0_18 = arith.constant 0 : index
    %c0_19 = arith.constant 0 : index
    %61 = vector.load %arg5[%c0_18, %c0_19] : memref<16x24xf32, #tpu.memory_space<vmem>>, vector<16x24xf32>
    tpu.vector_store %arg5[%c0_18, %c0_19], %52 {strides = array<i32>} : memref<16x24xf32, #tpu.memory_space<vmem>>, vector<16x24xf32>,
    return
  }
  func.func @transform_0(%arg0: i32) -> (i32, i32) {
    %c0_i32 = arith.constant 0 : i32
    %c0_i32_0 = arith.constant 0 : i32
    return %c0_i32, %arg0 : i32, i32
  }
  func.func @transform_1(%arg0: i32) -> (i32, i32) {
    %c0_i32 = arith.constant 0 : i32
    %c0_i32_0 = arith.constant 0 : i32
    %c0_i32_1 = arith.constant 0 : i32
    return %c0_i32, %c0_i32_0 : i32, i32
  }
  func.func @transform_2(%arg0: i32) -> (i32, i32) {
    %c0_i32 = arith.constant 0 : i32
    %c0_i32_0 = arith.constant 0 : i32
    %c0_i32_1 = arith.constant 0 : i32
    return %c0_i32, %c0_i32_0 : i32, i32
  }
  func.func @transform_3(%arg0: i32) -> (i32, i32) {
    %c0_i32 = arith.constant 0 : i32
    %c0_i32_0 = arith.constant 0 : i32
    return %arg0, %c0_i32 : i32, i32
  }
  func.func @transform_4(%arg0: i32) -> (i32, i32) {
    %c0_i32 = arith.constant 0 : i32
    %c0_i32_0 = arith.constant 0 : i32
    return %arg0, %c0_i32 : i32, i32
  }
}

</mosaic_0001>

<bundles_post_ra>
// kernel: tile.8
= control target key start
LH: loop header
LB: loop body
LE: loop exit
PB: predicated region body
PF: predicated region fallthrough
CT: control target
= control target key end

     0   :  { %s22_s0 = inlined_call_operand.vmem [shape: f32[32], index: 0, kind: input, shape index: {}]   ;;  %s23_s1 = inlined_call_operand.vmem [shape: f32[8,32], index: 1, kind: output, shape index: {}]  }
   0x1   :  { %v4_v0 = vld [vmem:[%s22_s0] ss:$0 sm:$0xff] }
   0x2   :  { %5 = vst [vmem:[%s23_s1] sm:$0xff] %v4_v0 }

// kernel: tile.9
= control target key start
LH: loop header
LB: loop body
LE: loop exit
PB: predicated region body
PF: predicated region fallthrough
CT: control target
= control target key end

     0   :  { %s7_s6 = smov 3  ;;  %s14_s9 = smov 3  ;;  %vm4_vm0 = vcmask 261120   ;;  %vm11_vm1 = vcmask 1048320   ;;  %vm18_vm2 = vcmask 785920   ;;  %vm25_vm3 = vcmask 523520   ;;  %s76_s0 = inlined_call_operand.vmem [shape: f32[8,32], index: 0, kind: input, shape index: {}]   ;;  %s77_s1 = inlined_call_operand.vmem [shape: f32[1,256], index: 1, kind: output, shape index: {}]  }
   0x1   :  { %v38_v0 = vld [vmem:[%s76_s0 + $0x3] ss:$4 sm:%s7_s6]   ;;  %s45_s10 = smov 96   ;;  %s21_s11 = smov 3  ;;  %v39_v1 = vld [vmem:[%s76_s0 + $0x2] ss:$4 sm:%s14_s9]  }
   0x2   :  { %9 = vrot.lane.b32.xlu0 %v38_v0, %s45_s10  ;;  %v40_v2 = vld [vmem:[%s76_s0 + $0x1] ss:$4 sm:%s21_s11]   ;;  %s2_s16 = smov 3  ;;  %s46_s17 = smov 32  }
   0x3   :  { %23 = vrot.lane.b32.xlu1 %v40_v2, %s46_s17  ;;  %v3_v3 = vld [vmem:[%s76_s0] ss:$4 sm:%s2_s16]   ;;  %s47_s0 = smov 64  }
   0x4   :  { %5 = vst.msk [vmem:[#allocation0] ss:$8 sm:$0x3] %vm4_vm0, %v3_v3  }
   0x6   :  { %16 = vrot.lane.b32.xlu0 %v39_v1, %s47_s0 }
  0x74   :  { %v10_v4 = vpop.permute.xlu0 %9  }
  0x75   :  { %12 = vst.msk [vmem:[#allocation0] ss:$8 sm:$0x3] %vm11_vm1, %v10_v4   ;;  %v24_v5 = vpop.permute.xlu1 %23  }
  0x78   :  { %v17_v6 = vpop.permute.xlu0 %16  }
  0x79   :  { %19 = vst.msk [vmem:[#allocation0] ss:$8 sm:$0x3] %vm18_vm2, %v17_v6  }
  0x7a   :  { %26 = vst.msk [vmem:[#allocation0] ss:$8 sm:$0x3] %vm25_vm3, %v24_v5  }
  0x81   :  { %v30_v7 = vld [vmem:[#allocation0] sm:$0x1]  ;;  %v34_v8 = vld [vmem:[#allocation0 + $0x8] sm:$0x1] }
  0x82   :  { %32 = vst [vmem:[%s77_s1] sm:$0x1] %v30_v7  ;;  %41 = vst [vmem:[%s77_s1 + $0x1] sm:$0x1] %v34_v8 }

// kernel: social_circle_layer.1
= control target key start
LH: loop header
LB: loop body
LE: loop exit
PB: predicated region body
PF: predicated region fallthrough
CT: control target
= control target key end

     0   :  { %v514_v2 = vmov 0.0   ;;  %v54_v12 = vlaneseq  ;;  %v515_v22 = vmov 1.0   ;;  %v516_v34 = vmov 1966171168   ;;  %s517_s12 = smov 104   ;;  %s655_s0 = inlined_call_operand.vmem [shape: f32[6,256], index: 0, kind: input, shape index: {}]   ;;  %s656_s1 = inlined_call_operand.vmem [shape: f32[24,256], index: 1, kind: input, shape index: {}]   ;;  %s657_s4 = inlined_call_operand.vmem [shape: f32[16,24], index: 4, kind: output, shape index: {1}]   ;;  %s658_s2 = inlined_call_operand.vmem [shape: f32[1,256], index: 2, kind: input, shape index: {}]   ;;  %s659_s3 = inlined_call_operand.vmem [shape: f32[16,256], index: 3, kind: output, shape index: {0}]  }
   0x1   :  { %v16_v0 = vld [vmem:[%s655_s0] ss:$8 sm:$0x3]  ;;  %v467_v1 = vld [vmem:[%s655_s0 + $0x1] ss:$8 sm:$0x3]  ;;  %436 = vmatprep.mubr.f32.mxu1 %v514_v2  ;;  %v141_v35 = vunpack.c.l.s4 %v516_v34 }
   0x2   :  { %v468_v3 = vld [vmem:[%s655_s0 + $0x2] ss:$8 sm:$0x3]  ;;  %v469_v4 = vld [vmem:[%s655_s0 + $0x3] ss:$8 sm:$0x3]  ;;  %v39_v5 = vmul.f32 %v16_v0, %v16_v0  ;;  %v40_v6 = vmul.f32 %v467_v1, %v467_v1 }
   0x3   :  { %v27_v7 = vsub.f32 %v16_v0, %v468_v3  ;;  %v28_v8 = vsub.f32 %v467_v1, %v469_v4  ;;  %v556_v14 = vand.u32 127, %v54_v12  ;;  %v471_v16 = vld [vmem:[%s655_s0 + $0x5] ss:$8 sm:$0x3]  ;;  %v564_v18 = vshrl.u32 %v54_v12, 7 }
   0x4   :  { %v41_v9 = vadd.f32 %v40_v6, %v39_v5  ;;  %v51_v17 = vmul.f32 1.2732395, %v471_v16  ;;  %v470_v28 = vld [vmem:[%s655_s0 + $0x4] ss:$8 sm:$0x3]  ;;  %vm121_vm6 = vcmask 1040384   ;;  %v142_v45 = vunpack.c.0.s8 %v141_v35 }
   0x5   :  { %v29_v10 = vmul.f32 %v27_v7, %v27_v7  ;;  %v30_v11 = vmul.f32 %v28_v8, %v28_v8  ;;  %v559_v15 = vadd.s32 128, %v556_v14  ;;  %v572_v25 = vsub.s32 0, %v564_v18 }
   0x6   :  { %506 = vrsqrt.f32 %v41_v9  ;;  %vm44_vm1 = vcmp.eq.f32.partialorder %v41_v9, inf  ;;  %v47_v21 = vand.u32 2147483648, %v41_v9  ;;  %vm46_vm2 = vcmp.eq.f32.partialorder %v41_v9, 0.0 }
   0x7   :  { %v31_v13 = vadd.f32 %v30_v11, %v29_v10  ;;  %v61_v19 = vshra.s32 %v559_v15, 4  ;;  %v500_v24 = vtrunc.f32 %v51_v17  ;;  %v575_v26 = vsub.s32 1, %v564_v18  ;;  %v347_v15 = vld [vmem:[%s656_s1] sm:$0xff] }
   0x8   :  { %vm49_vm5 = vcmp.ne.f32.partialorder %v470_v28, 0.0  ;;  %v114_v40 = vrot.slane %v471_v16, %v572_v25  ;;  %vm124_vm7 = vcmask 1041408   ;;  %vm127_vm8 = vcmask 1042432  }
   0x9   :  { %508 = vrsqrt.f32 %v31_v13  ;;  %vm63_vm0 = vcmp.eq.s32.totalorder %v564_v18, %v61_v19  ;;  %vm34_vm3 = vcmp.eq.f32.partialorder %v31_v13, inf  ;;  %v37_v29 = vand.u32 2147483648, %v31_v13 }
   0xa   :  { %478 = vmatprep.mubr.msk.f32.mxu0 %vm63_vm0, %v515_v22  ;;  %vm36_vm4 = vcmp.eq.f32.partialorder %v31_v13, 0.0  ;;  %v501_v33 = vcvt.f32.s32 %v500_v24  ;;  %v118_v41 = vrot.slane %v471_v16, %v575_v26  ;;  %vm130_vm9 = vcmask 1043456  }
   0xb   :  { %vm133_vm10 = vcmask 1044480   ;;  %v145_v55 = vsub.s32 %v142_v45, %v564_v18  ;;  %vm365_vm0 = vcmask 195584  }
   0xc   :  { %v53_v44 = vsel %vm49_vm5, %v501_v33, 4294967295 }
   0xd   :  { %v81_v50 = vrot.slane %v53_v44, %v575_v26  ;;  %v77_v56 = vrot.slane %v53_v44, %v572_v25 }
   0xf   :  { %vm83_vm11 = vcmp.eq.s32.totalorder %v564_v18, %v81_v50  ;;  %vm82_vm12 = vcmp.eq.s32.totalorder %v564_v18, %v77_v56 }
  0x10   :  { %v507_v20 = vpop.eup %506  ;;  %v477_v3 = vsel %vm83_vm11, 1.0, %v514_v2  ;;  %v476_v4 = vsel %vm82_vm12, 1.0, %v514_v2 }
  0x11   :  { %v43_v23 = vmul.f32 %v507_v20, %v41_v9 }
  0x13   :  { %v509_v27 = vpop.eup %508  ;;  %v45_v30 = vsel %vm44_vm1, %v41_v9, %v43_v23 }
  0x14   :  { %v33_v31 = vmul.f32 %v509_v27, %v31_v13  ;;  %v48_v32 = vsel %vm46_vm2, %v47_v21, %v45_v30 }
  0x15   :  { %v103_v37 = vrot.slane %v48_v32, %v572_v25  ;;  %v107_v38 = vrot.slane %v48_v32, %v575_v26 }
  0x16   :  { %v35_v36 = vsel %vm34_vm3, %v31_v13, %v33_v31 }
  0x17   :  { %v38_v39 = vsel %vm36_vm4, %v37_v29, %v35_v36 }
  0x18   :  { %v92_v42 = vrot.slane %v38_v39, %v572_v25  ;;  %v96_v43 = vrot.slane %v38_v39, %v575_v26 }
  0x1a   :  { %v122_v46 = vsel %vm121_vm6, %v92_v42, %v103_v37  ;;  %v123_v47 = vsel %vm121_vm6, %v96_v43, %v107_v38 }
  0x1b   :  { %v125_v48 = vsel %vm124_vm7, %v122_v46, %v114_v40  ;;  %v126_v49 = vsel %vm124_vm7, %v123_v47, %v118_v41  ;;  %v60_v47 = vshra.s32 %v556_v14, 4  ;;  %v350_v14 = vld [vmem:[%s656_s1 + $0x18] sm:$0xff] }
  0x1c   :  { %v128_v51 = vsel %vm127_vm8, %v125_v48, 1.0  ;;  %v129_v52 = vsel %vm127_vm8, %v126_v49, 1.0  ;;  %v56_v48 = vadd.s32 8, %v564_v18  ;;  %v348_v49 = vld [vmem:[%s656_s1 + $0x8] sm:$0xff] }
  0x1d   :  { %v131_v53 = vsel %vm130_vm9, %v128_v51, 1.0  ;;  %v132_v54 = vsel %vm130_vm9, %v129_v52, 1.0  ;;  %vm62_vm13 = vcmp.eq.s32.totalorder %v564_v18, %v60_v47  ;;  %v496_v18 = vpack.c.bf16 %v350_v14, %v348_v49  ;;  %v352_v51 = vld [vmem:[%s656_s1 + $0x28] sm:$0xff] }
  0x1e   :  { %v134_v57 = vsel %vm133_vm10, %v131_v53, 1.0  ;;  %v135_v58 = vsel %vm133_vm10, %v132_v54, 1.0  ;;  %vm65_vm14 = vcmp.eq.s32.totalorder %v56_v48, %v61_v19  ;;  %vm64_vm15 = vcmp.eq.s32.totalorder %v56_v48, %v60_v47  ;;  %v349_v19 = vld [vmem:[%s656_s1 + $0x10] sm:$0xff]  ;;  %v351_v54 = vld [vmem:[%s656_s1 + $0x20] sm:$0xff] }
  0x1f   :  { %v138_v59 = vcombine.low %v134_v57, %v135_v58  ;;  %v139_v60 = vcombine.high %v134_v57, %v135_v58  ;;  %v498_v50 = vpack.c.bf16 %v349_v19, %v347_v15  ;;  %497 = vmatprep.subr.bf16.mxu1 %v496_v18 }
  0x21   :  { %v146_v61 = vrot.slane %v138_v59, %v145_v55  ;;  %v153_v62 = vrot.slane %v139_v60, %v145_v55  ;;  %499 = vmatpush1.bf16.msra.mxu1 %v498_v50 }
  0x22   :  { %376 = vmatprep.subr.mxu1 %v352_v51 }
  0x23   :  { %v154_v63 = vcombine.high %v146_v61, %v146_v61  ;;  %v162_v0 = vrot.slane %v146_v61, %v145_v55  ;;  %v155_v1 = vcombine.high %v153_v62, %v153_v62  ;;  %v169_v9 = vrot.slane %v153_v62, %v145_v55 }
  0x25   :  { %v176_v5 = vrot.slane %v154_v63, %v145_v55  ;;  %v193_v6 = vrot.slane %v162_v0, %v575_v26  ;;  %v189_v7 = vrot.slane %v162_v0, %v572_v25  ;;  %v184_v8 = vcombine.high %v162_v0, %v162_v0  ;;  %377 = vmatpush1.msra.mxu1 %v351_v54  ;;  %v353_v0 = vld [vmem:[%s658_s2] sm:$0x3] }
  0x26   :  { %v183_v10 = vrot.slane %v155_v1, %v145_v55  ;;  %v225_v32 = vrot.slane %v169_v9, %v575_v26  ;;  %v221_v41 = vrot.slane %v169_v9, %v572_v25  ;;  %v358_v1 = vrot.slane %v353_v0, %v572_v25 }
  0x27   :  { %v201_v11 = vrot.slane %v176_v5, %v575_v26  ;;  %v247_v12 = vmul.f32 %v477_v3, %v193_v6  ;;  %v197_v13 = vrot.slane %v176_v5, %v572_v25  ;;  %v246_v16 = vmul.f32 %v476_v4, %v189_v7 }
  0x28   :  { %v185_v17 = vcombine.high %v176_v5, %v176_v5  ;;  %v209_v20 = vrot.slane %v184_v8, %v575_v26  ;;  %v205_v28 = vrot.slane %v184_v8, %v572_v25  ;;  %v233_v33 = vrot.slane %v183_v10, %v575_v26 }
  0x29   :  { %v249_v21 = vmul.f32 %v477_v3, %v201_v11  ;;  %v248_v23 = vmul.f32 %v476_v4, %v197_v13  ;;  %v255_v38 = vmul.f32 %v477_v3, %v225_v32  ;;  %v229_v42 = vrot.slane %v183_v10, %v572_v25 }
  0x2a   :  { %v217_v24 = vrot.slane %v185_v17, %v575_v26  ;;  %v251_v27 = vmul.f32 %v477_v3, %v209_v20  ;;  %v213_v29 = vrot.slane %v185_v17, %v572_v25  ;;  %v250_v36 = vmul.f32 %v476_v4, %v205_v28 }
  0x2b   :  { %v484_v30 = vpack.c.bf16 %v249_v21, %v247_v12  ;;  %v486_v31 = vpack.c.bf16 %v248_v23, %v246_v16  ;;  %v257_v39 = vmul.f32 %v477_v3, %v233_v33  ;;  %v254_v44 = vmul.f32 %v476_v4, %v221_v41 }
  0x2c   :  { %v253_v34 = vmul.f32 %v477_v3, %v217_v24  ;;  %v252_v37 = vmul.f32 %v476_v4, %v213_v29  ;;  %v256_v45 = vmul.f32 %v476_v4, %v229_v42  ;;  %v362_v3 = vrot.slane %v353_v0, %v575_v26 }
  0x2d   :  { %485 = vmatprep.subr.bf16.mxu0 %v484_v30  ;;  %v492_v43 = vpack.c.bf16 %v257_v39, %v255_v38 }
  0x2e   :  { %487 = vmatpush1.bf16.xpose.msra.mxu0 %v486_v31  ;;  %v488_v35 = vpack.c.bf16 %v253_v34, %v251_v27  ;;  %v490_v40 = vpack.c.bf16 %v252_v37, %v250_v36  ;;  %v494_v46 = vpack.c.bf16 %v256_v45, %v254_v44 }
  0x30   :  { %489 = vmatprep.subr.bf16.mxu0 %v488_v35 }
  0x36   :  { %491 = vmatpush1.bf16.xpose.msra.mxu0 %v490_v40 }
  0x37   :  { %493 = vmatprep.subr.bf16.mxu0 %v492_v43 }
  0x3e   :  { %495 = vmatpush1.bf16.xpose.msra.mxu0 %v494_v46 }
  0x45   :  { %479 = vmatmul.mubr.msk.f32.vlgmr.msra.gmra.mrb[0].mxu0 %vm62_vm13, %v515_v22 }
  0x46   :  { %480 = vmatprep.mubr.msk.f32.mxu0 %vm65_vm14, %v515_v22 }
  0x49   :  { %481 = vmatmul.mubr.msk.f32.gmra.mrb[2].mxu0 %vm64_vm15, %v515_v22 }
 0x118   :  { %v324_v22 = vpop.f32.mrb[0].mxu0 }
 0x119   :  { %v333_v52 = vadd.f32 0.0001, %v324_v22  ;;  %v326_v53 = vpop.f32.mrb[1].mxu0 }
 0x11b   :  { %510 = vrcp.f32 %v333_v52 }
 0x11c   :  { %v329_v55 = vpop.f32.mrb[2].mxu0 }
 0x11d   :  { %v334_v56 = vadd.f32 0.0001, %v329_v55  ;;  %v331_v57 = vpop.f32.mrb[3].mxu0 }
 0x11f   :  { %512 = vrcp.f32 %v334_v56 }
 0x125   :  { %v511_v58 = vpop.eup %510 }
 0x126   :  { %339 = vrot.lane.b32.xlu0 %v511_v58, %s517_s12 }
 0x129   :  { %v513_v59 = vpop.eup %512 }
 0x12a   :  { %341 = vrot.lane.b32.xlu0 %v513_v59, %s517_s12 }
 0x198   :  { %v340_v60 = vpop.permute.xlu0 %339 }
 0x199   :  { %v345_v61 = vmul.f32 %v340_v60, %v324_v22 }
 0x19b   :  { %482 = vmatmul.mubr.msk.f32.vlgmr.msra.gmra.mrb[0].mxu1 %vm365_vm0, %v345_v61  ;;  %457 = vst.msk [vmem:[%s657_s4] sm:$0xff] %vm365_vm0, %v345_v61 }
 0x19c   :  { %v342_v62 = vpop.permute.xlu0 %341  ;;  %442 = vmatprep.mubr.f32.mxu1 %v514_v2 }
 0x19d   :  { %v346_v63 = vmul.f32 %v342_v62, %v329_v55 }
 0x19f   :  { %458 = vst.msk [vmem:[%s657_s4 + $0x8] sm:$0xff] %vm365_vm0, %v346_v63  ;;  %483 = vmatmul.mubr.msk.f32.gmra.mrb[2].mxu1 %vm365_vm0, %v346_v63 }
 0x26e   :  { %v438_v4 = vpop.f32.mrb[0].mxu1 }
 0x26f   :  { %v439_v5 = vadd.f32 %v438_v4, %v358_v1  ;;  %v440_v6 = vpop.f32.mrb[1].mxu1 }
 0x270   :  { %v441_v7 = vadd.f32 %v440_v6, %v362_v3 }
 0x271   :  { %v449_v8 = vmax.f32 %v439_v5, 0.0 }
 0x272   :  { %v450_v2 = vmax.f32 %v441_v7, 0.0  ;;  %v444_v9 = vpop.f32.mrb[2].mxu1 }
 0x273   :  { %453 = vst [vmem:[%s659_s3] sm:$0xff] %v449_v8  ;;  %v445_v10 = vadd.f32 %v444_v9, %v358_v1  ;;  %v446_v11 = vpop.f32.mrb[3].mxu1 }
 0x274   :  { %454 = vst [vmem:[%s659_s3 + $0x8] sm:$0xff] %v450_v2  ;;  %v447_v25 = vadd.f32 %v446_v11, %v362_v3 }
 0x275   :  { %v451_v12 = vmax.f32 %v445_v10, 0.0 }
 0x276   :  { %v452_v26 = vmax.f32 %v447_v25, 0.0 }
 0x277   :  { %455 = vst [vmem:[%s659_s3 + $0x10] sm:$0xff] %v451_v12 }
 0x278   :  { %456 = vst [vmem:[%s659_s3 + $0x18] sm:$0xff] %v452_v26 }

</bundles_post_ra>
